<compile_context>
chip_gen: v5e
topology: v5e:2x2
jax: 0.10.0
libtpu: 0.0.40
codegen_flags: <defaults>
</compile_context>

<pallas_src>
import functools

import jax
import jax.numpy as jnp
import numpy as np
from jax.experimental import pallas as pl
from jax.experimental.pallas import tpu as pltpu

_LANES = 128      # vreg lane width
_SUB = 8          # f32 vreg sublane count (accumulators are f32)
_TM_CAP = 8192    # max sublane rows per input tile (4 MiB per f32 buffer)


def _round_up(a, b):
    return (a + b - 1) // b * b


def _sublane_tile(dtype):
    # Packed sublane tile: (8,128) f32, (16,128) bf16/f16, (32,128) int8/fp8.
    return max(_SUB, 32 // jnp.dtype(dtype).itemsize)


def _psnr_kernel(x_ref, y_ref, sumsq_ref, ymax_ref, *, tm, m_rows, kh,
                 any_partial):
    """Grid = (B, S, KH).  x_ref / y_ref: (TM, 128) chunk of sample b.

    sumsq_ref / ymax_ref: (8, 128) f32 output blocks used directly as
    per-(sample, split) vector accumulators (resident across the k axis).
    """
    s = pl.program_id(1)
    k = pl.program_id(2)

    # Per-(sample, split) init at the first chunk.
    @pl.when(k == 0)
    def _():
        sumsq_ref[...] = jnp.zeros_like(sumsq_ref)
        ymax_ref[...] = jnp.full_like(ymax_ref, -jnp.inf)

    def accumulate(masked):
        x = x_ref[...].astype(jnp.float32)      # (TM, 128)
        y = y_ref[...].astype(jnp.float32)
        d = y - x
        if masked:
            # Only the overhang rows of a partial chunk need masking; the
            # where() must run BEFORE d*d and the max (garbage may be NaN/inf).
            g = s * kh + k                      # global chunk index
            row = jax.lax.broadcasted_iota(jnp.int32, (tm, _LANES), 0)
            valid = (g * tm + row) < m_rows
            d = jnp.where(valid, d, jnp.float32(0.0))
            y = jnp.where(valid, y, jnp.float32(-jnp.inf))
        # Fold TM sublane rows down to one (8,128) vreg: pure VPU adds/maxes,
        # no cross-lane XLU work, no scalar round-trips in the loop.
        sq = (d * d).reshape(tm // _SUB, _SUB, _LANES)
        ym = y.reshape(tm // _SUB, _SUB, _LANES)
        sumsq_ref[...] = sumsq_ref[...] + jnp.sum(sq, axis=0)
        ymax_ref[...] = jnp.maximum(ymax_ref[...], jnp.max(ym, axis=0))

    if any_partial:
        # Pay for the iota/where mask only on chunks not fully inside the
        # array; all fully-covered chunks take the plain accumulate.
        g = s * kh + k
        is_full = (g + 1) * tm <= m_rows

        @pl.when(is_full)
        def _():
            accumulate(False)

        @pl.when(jnp.logical_not(is_full))
        def _():
            accumulate(True)
    else:
        accumulate(False)


def psnr_loss(xs, ys, *, tm_cap=_TM_CAP):
    """xs, ys: (B, ...) arrays (e.g. NCHW). Returns scalar float32 loss."""
    assert xs.shape == ys.shape
    B = xs.shape[0]
    n_elems = int(np.prod(xs.shape[1:]))

    xf = xs.reshape(B, n_elems)
    yf = ys.reshape(B, n_elems)

    m_rows = n_elems // _LANES          # full 128-lane rows per sample
    n_main = m_rows * _LANES
    n_tail = n_elems - n_main

    if m_rows == 0:
        # Sample smaller than one lane row: trivial amount of data, pure JAX.
        x32 = xf.astype(jnp.float32)
        y32 = yf.astype(jnp.float32)
        d = y32 - x32
        sumsq = jnp.sum(d * d, axis=1)
        ymax = jnp.max(y32, axis=1)
    else:
        if n_tail:
            # Ragged per-sample length: kernel sees only the 128-aligned
            # prefix; the <=127-element tail is fixed up in pure JAX below
            # (no full-tensor jnp.pad copy).
            x_main = xf[:, :n_main].reshape(B, m_rows, _LANES)
            y_main = yf[:, :n_main].reshape(B, m_rows, _LANES)
        else:
            # Common case: copy-free reshape.
            x_main = xf.reshape(B, m_rows, _LANES)
            y_main = yf.reshape(B, m_rows, _LANES)

        # dtype-aware tile alignment (bf16 needs 16 sublanes, int8/fp8 need 32).
        sub = max(_sublane_tile(xs.dtype), _sublane_tile(ys.dtype))
        cap = max(sub, tm_cap // sub * sub)
        tm = min(_round_up(m_rows, sub), cap)
        k_total = (m_rows + tm - 1) // tm

        # v7x megacore: if the batch alone cannot occupy both TensorCores,
        # split each sample's chunks across a second parallel grid axis.
        splits = 2 if (B == 1 and k_total >= 2) else 1
        kh = (k_total + splits - 1) // splits
        any_partial = (splits * kh * tm) != m_rows
        last_block = k_total - 1

        def in_map(b, s, k):
            # Clamp so empty trailing slots of the last split never issue a
            # fully out-of-bounds DMA; their rows are masked out in-kernel.
            return (b, jnp.minimum(s * kh + k, last_block), 0)

        kernel = functools.partial(_psnr_kernel, tm=tm, m_rows=m_rows, kh=kh,
                                   any_partial=any_partial)

        in_bytes = B * n_main * (xf.dtype.itemsize + yf.dtype.itemsize)
        out_bytes = 2 * B * splits * _SUB * _LANES * 4
        cost = pl.CostEstimate(flops=4 * B * n_main, transcendentals=0,
                               bytes_accessed=in_bytes + out_bytes)

        out_sumsq, out_ymax = pl.pallas_call(
            kernel,
            out_shape=(
                jax.ShapeDtypeStruct((B, splits, _SUB, _LANES), jnp.float32),
                jax.ShapeDtypeStruct((B, splits, _SUB, _LANES), jnp.float32),
            ),
            grid_spec=pltpu.PrefetchScalarGridSpec(
                num_scalar_prefetch=0,
                grid=(B, splits, kh),
                in_specs=[
                    pl.BlockSpec((None, tm, _LANES), in_map),
                    pl.BlockSpec((None, tm, _LANES), in_map),
                ],
                out_specs=[
                    pl.BlockSpec((None, None, _SUB, _LANES),
                                 lambda b, s, k: (b, s, 0, 0)),
                    pl.BlockSpec((None, None, _SUB, _LANES),
                                 lambda b, s, k: (b, s, 0, 0)),
                ],
            ),
            compiler_params=pltpu.CompilerParams(
                # Per-(sample, split) outputs -> first two axes are independent
                # and can be sharded across TensorCores (v7x megacore).
                dimension_semantics=("parallel", "parallel", "arbitrary"),
                # Up to 2 inputs x 2 buffers x 4 MiB of pipelined tiles; raise
                # the limit above v5e's 16 MiB default, stay under v7x's 64 MiB.
                vmem_limit_bytes=48 * 1024 * 1024,
            ),
            cost_estimate=cost,
        )(x_main, y_main)

        sumsq = jnp.sum(out_sumsq, axis=(1, 2, 3))   # (B,)
        ymax = jnp.max(out_ymax, axis=(1, 2, 3))     # (B,)

        if n_tail:
            xt = xf[:, n_main:].astype(jnp.float32)  # (B, <=127) tiny slice
            yt = yf[:, n_main:].astype(jnp.float32)
            dt = yt - xt
            sumsq = sumsq + jnp.sum(dt * dt, axis=1)
            ymax = jnp.maximum(ymax, jnp.max(yt, axis=1))

    mse = sumsq / jnp.float32(n_elems)
    psnr = jnp.float32(10.0) * jnp.log10(ymax * ymax / mse)
    return -jnp.mean(psnr)
    # TODO(synk): the PyTorch module's NaN-debug branch (matplotlib image dumps
    # + raise) is host-side debugging and has no Pallas equivalent; omitted.


def psnr_loss_ref(xs, ys):
    """Pure-JAX reference mirroring the PyTorch module (f32 accumulation)."""
    B = xs.shape[0]
    x = xs.astype(jnp.float32).reshape(B, -1)
    y = ys.astype(jnp.float32).reshape(B, -1)
    mse = jnp.mean((y - x) ** 2, axis=1)
    dr = jnp.max(y, axis=1)
    psnr = 10.0 * jnp.log10(dr ** 2 / mse)
    return -jnp.mean(psnr)


if __name__ == "__main__":
    key = jax.random.PRNGKey(0)
    k1, k2, k3, k4, k5, k6, k7, k8 = jax.random.split(key, 8)

    # Test 1: clean NCHW shape (per-sample size multiple of 128) — zero-copy path.
    xs = jax.random.normal(k1, (2, 4, 16, 16), dtype=jnp.float32)
    ys = jax.random.uniform(k2, (2, 4, 16, 16), dtype=jnp.float32)
    loss = jax.block_until_ready(psnr_loss(xs, ys))
    ref = jax.block_until_ready(psnr_loss_ref(xs, ys))
    assert np.isfinite(float(loss)), "non-finite loss (clean)"
    assert np.allclose(float(loss), float(ref), rtol=1e-4, atol=1e-4), (
        f"mismatch (clean): kernel={float(loss)} ref={float(ref)}")

    # Test 2: ragged per-sample size (300 = 2*128 + 44) — aligned-prefix kernel
    # + pure-JAX tail correction (no full-tensor pad).
    xs2 = jax.random.normal(k3, (2, 3, 10, 10), dtype=jnp.float32)
    ys2 = jax.random.uniform(k4, (2, 3, 10, 10), dtype=jnp.float32)
    loss2 = jax.block_until_ready(psnr_loss(xs2, ys2))
    ref2 = jax.block_until_ready(psnr_loss_ref(xs2, ys2))
    assert np.isfinite(float(loss2)), "non-finite loss (ragged)"
    assert np.allclose(float(loss2), float(ref2), rtol=1e-4, atol=1e-4), (
        f"mismatch (ragged): kernel={float(loss2)} ref={float(ref2)}")

    # Test 3: B == 1 with multiple chunks (small tm_cap forces it) — exercises
    # the 2-way split (megacore) axis, empty-slot clamp, and multi-step accum.
    xs3 = jax.random.normal(k5, (1, 4, 48, 16), dtype=jnp.float32)
    ys3 = jax.random.uniform(k6, (1, 4, 48, 16), dtype=jnp.float32)
    loss3 = jax.block_until_ready(psnr_loss(xs3, ys3, tm_cap=8))
    ref3 = jax.block_until_ready(psnr_loss_ref(xs3, ys3))
    assert np.isfinite(float(loss3)), "non-finite loss (split)"
    assert np.allclose(float(loss3), float(ref3), rtol=1e-4, atol=1e-4), (
        f"mismatch (split): kernel={float(loss3)} ref={float(ref3)}")

    # Test 4: bf16 inputs — exercises dtype-aware (16,128) sublane alignment.
    xs4 = jax.random.normal(k7, (2, 4, 16, 16), dtype=jnp.bfloat16)
    ys4 = jax.random.uniform(k8, (2, 4, 16, 16), dtype=jnp.bfloat16)
    loss4 = jax.block_until_ready(psnr_loss(xs4, ys4))
    ref4 = jax.block_until_ready(psnr_loss_ref(xs4, ys4))
    assert np.isfinite(float(loss4)), "non-finite loss (bf16)"
    assert np.allclose(float(loss4), float(ref4), rtol=1e-3, atol=1e-3), (
        f"mismatch (bf16): kernel={float(loss4)} ref={float(ref4)}")

    print("KERNEL_OK")
</pallas_src>

<mosaic_0001>
module attributes {stable_mosaic.version = 11 : i64} {
  func.func @_psnr_kernel(%arg0: i32, %arg1: i32, %arg2: i32, %arg3: memref<1x8x128xf32, #tpu.memory_space<vmem>>, %arg4: memref<1x8x128xf32, #tpu.memory_space<vmem>>, %arg5: memref<1x1x8x128xf32, #tpu.memory_space<vmem>>, %arg6: memref<1x1x8x128xf32, #tpu.memory_space<vmem>>) attributes {dimension_semantics = [#tpu.dimension_semantics<parallel>, #tpu.dimension_semantics<parallel>, #tpu.dimension_semantics<arbitrary>], iteration_bounds = array<i64: 2, 1, 1>, scalar_prefetch = 0 : i64, scratch_operands = 0 : i64, tpu.core_type = #tpu.core_type<tc>, window_params = [{transform_indices = @transform_0, window_bounds = array<i64: 1, 8, 128>}, {transform_indices = @transform_1, window_bounds = array<i64: 1, 8, 128>}, {transform_indices = @transform_2, window_bounds = array<i64: 1, 1, 8, 128>}, {transform_indices = @transform_3, window_bounds = array<i64: 1, 1, 8, 128>}]} {
    %c0_i32 = arith.constant 0 : i32
    %0 = arith.cmpi eq, %arg2, %c0_i32 : i32
    %1 = arith.extui %0 : i1 to i32
    %c0_i32_0 = arith.constant 0 : i32
    %2 = arith.cmpi ne, %1, %c0_i32_0 : i32
    scf.if %2 {
      %cst_23 = arith.constant 0.000000e+00 : f32
      %25 = vector.broadcast %cst_23 : f32 to vector<8x128xf32>
      %c0_24 = arith.constant 0 : index
      %c0_25 = arith.constant 0 : index
      %c0_26 = arith.constant 0 : index
      %c0_27 = arith.constant 0 : index
      %26 = vector.load %arg5[%c0_24, %c0_25, %c0_26, %c0_27] : memref<1x1x8x128xf32, #tpu.memory_space<vmem>>, vector<1x1x8x128xf32>
      %27 = vector.shape_cast %26 : vector<1x1x8x128xf32> to vector<8x128xf32>
      %28 = vector.shape_cast %25 : vector<8x128xf32> to vector<1x1x8x128xf32>
      tpu.vector_store %arg5[%c0_24, %c0_25, %c0_26, %c0_27], %28 {strides = array<i32>} : memref<1x1x8x128xf32, #tpu.memory_space<vmem>>, vector<1x1x8x128xf32>,
      %cst_28 = arith.constant 0xFF800000 : f32
      %29 = vector.broadcast %cst_28 : f32 to vector<8x128xf32>
      %c0_29 = arith.constant 0 : index
      %c0_30 = arith.constant 0 : index
      %c0_31 = arith.constant 0 : index
      %c0_32 = arith.constant 0 : index
      %30 = vector.load %arg6[%c0_29, %c0_30, %c0_31, %c0_32] : memref<1x1x8x128xf32, #tpu.memory_space<vmem>>, vector<1x1x8x128xf32>
      %31 = vector.shape_cast %30 : vector<1x1x8x128xf32> to vector<8x128xf32>
      %32 = vector.shape_cast %29 : vector<8x128xf32> to vector<1x1x8x128xf32>
      tpu.vector_store %arg6[%c0_29, %c0_30, %c0_31, %c0_32], %32 {strides = array<i32>} : memref<1x1x8x128xf32, #tpu.memory_space<vmem>>, vector<1x1x8x128xf32>,
    } else {
    }
    %c0 = arith.constant 0 : index
    %c0_1 = arith.constant 0 : index
    %c0_2 = arith.constant 0 : index
    %3 = vector.load %arg3[%c0, %c0_1, %c0_2] : memref<1x8x128xf32, #tpu.memory_space<vmem>>, vector<1x8x128xf32>
    %4 = vector.shape_cast %3 : vector<1x8x128xf32> to vector<8x128xf32>
    %c0_3 = arith.constant 0 : index
    %c0_4 = arith.constant 0 : index
    %c0_5 = arith.constant 0 : index
    %5 = vector.load %arg4[%c0_3, %c0_4, %c0_5] : memref<1x8x128xf32, #tpu.memory_space<vmem>>, vector<1x8x128xf32>
    %6 = vector.shape_cast %5 : vector<1x8x128xf32> to vector<8x128xf32>
    %7 = arith.subf %6, %4 : vector<8x128xf32>
    %8 = arith.mulf %7, %7 : vector<8x128xf32>
    %9 = vector.shape_cast %8 : vector<8x128xf32> to vector<1x8x128xf32>
    %10 = vector.shape_cast %6 : vector<8x128xf32> to vector<1x8x128xf32>
    %c0_6 = arith.constant 0 : index
    %c0_7 = arith.constant 0 : index
    %c0_8 = arith.constant 0 : index
    %c0_9 = arith.constant 0 : index
    %11 = vector.load %arg5[%c0_6, %c0_7, %c0_8, %c0_9] : memref<1x1x8x128xf32, #tpu.memory_space<vmem>>, vector<1x1x8x128xf32>
    %12 = vector.shape_cast %11 : vector<1x1x8x128xf32> to vector<8x128xf32>
    %cst = arith.constant dense<0.000000e+00> : vector<8x128xf32>
    %13 = vector.multi_reduction <add>, %9, %cst [0] : vector<1x8x128xf32> to vector<8x128xf32>
    %14 = arith.addf %12, %13 : vector<8x128xf32>
    %c0_10 = arith.constant 0 : index
    %c0_11 = arith.constant 0 : index
    %c0_12 = arith.constant 0 : index
    %c0_13 = arith.constant 0 : index
    %15 = vector.load %arg5[%c0_10, %c0_11, %c0_12, %c0_13] : memref<1x1x8x128xf32, #tpu.memory_space<vmem>>, vector<1x1x8x128xf32>
    %16 = vector.shape_cast %15 : vector<1x1x8x128xf32> to vector<8x128xf32>
    %17 = vector.shape_cast %14 : vector<8x128xf32> to vector<1x1x8x128xf32>
    tpu.vector_store %arg5[%c0_10, %c0_11, %c0_12, %c0_13], %17 {strides = array<i32>} : memref<1x1x8x128xf32, #tpu.memory_space<vmem>>, vector<1x1x8x128xf32>,
    %c0_14 = arith.constant 0 : index
    %c0_15 = arith.constant 0 : index
    %c0_16 = arith.constant 0 : index
    %c0_17 = arith.constant 0 : index
    %18 = vector.load %arg6[%c0_14, %c0_15, %c0_16, %c0_17] : memref<1x1x8x128xf32, #tpu.memory_space<vmem>>, vector<1x1x8x128xf32>
    %19 = vector.shape_cast %18 : vector<1x1x8x128xf32> to vector<8x128xf32>
    %cst_18 = arith.constant dense<0xFF800000> : vector<8x128xf32>
    %20 = vector.multi_reduction <maximumf>, %10, %cst_18 [0] : vector<1x8x128xf32> to vector<8x128xf32>
    %21 = arith.maximumf %19, %20 : vector<8x128xf32>
    %c0_19 = arith.constant 0 : index
    %c0_20 = arith.constant 0 : index
    %c0_21 = arith.constant 0 : index
    %c0_22 = arith.constant 0 : index
    %22 = vector.load %arg6[%c0_19, %c0_20, %c0_21, %c0_22] : memref<1x1x8x128xf32, #tpu.memory_space<vmem>>, vector<1x1x8x128xf32>
    %23 = vector.shape_cast %22 : vector<1x1x8x128xf32> to vector<8x128xf32>
    %24 = vector.shape_cast %21 : vector<8x128xf32> to vector<1x1x8x128xf32>
    tpu.vector_store %arg6[%c0_19, %c0_20, %c0_21, %c0_22], %24 {strides = array<i32>} : memref<1x1x8x128xf32, #tpu.memory_space<vmem>>, vector<1x1x8x128xf32>,
    return
  }
  func.func @transform_0(%arg0: i32, %arg1: i32, %arg2: i32) -> (i32, i32, i32) {
    %c1_i32 = arith.constant 1 : i32
    %0 = arith.muli %arg1, %c1_i32 : i32
    %1 = arith.addi %0, %arg2 : i32
    %c0_i32 = arith.constant 0 : i32
    %2 = arith.minsi %1, %c0_i32 : i32
    %c0_i32_0 = arith.constant 0 : i32
    %c0_i32_1 = arith.constant 0 : i32
    return %arg0, %2, %c0_i32_0 : i32, i32, i32
  }
  func.func @transform_1(%arg0: i32, %arg1: i32, %arg2: i32) -> (i32, i32, i32) {
    %c1_i32 = arith.constant 1 : i32
    %0 = arith.muli %arg1, %c1_i32 : i32
    %1 = arith.addi %0, %arg2 : i32
    %c0_i32 = arith.constant 0 : i32
    %2 = arith.minsi %1, %c0_i32 : i32
    %c0_i32_0 = arith.constant 0 : i32
    %c0_i32_1 = arith.constant 0 : i32
    return %arg0, %2, %c0_i32_0 : i32, i32, i32
  }
  func.func @transform_2(%arg0: i32, %arg1: i32, %arg2: i32) -> (i32, i32, i32, i32) {
    %c0_i32 = arith.constant 0 : i32
    %c0_i32_0 = arith.constant 0 : i32
    %c0_i32_1 = arith.constant 0 : i32
    return %arg0, %arg1, %c0_i32, %c0_i32_0 : i32, i32, i32, i32
  }
  func.func @transform_3(%arg0: i32, %arg1: i32, %arg2: i32) -> (i32, i32, i32, i32) {
    %c0_i32 = arith.constant 0 : i32
    %c0_i32_0 = arith.constant 0 : i32
    %c0_i32_1 = arith.constant 0 : i32
    return %arg0, %arg1, %c0_i32, %c0_i32_0 : i32, i32, i32, i32
  }
}

</mosaic_0001>

<bundles_post_ra>
// kernel: tpu_custom_call.1
= control target key start
LH: loop header
LB: loop body
LE: loop exit
PB: predicated region body
PF: predicated region fallthrough
CT: control target
= control target key end

     0   :  { %9 = vsyncpa [#allocation3], 0  ;;  %s930_s0 = inlined_call_operand.hbm [shape: f32[2,8,128], index: 0, kind: input, shape index: {}]   ;;  %s931_s1 = inlined_call_operand.hbm [shape: f32[2,8,128], index: 1, kind: input, shape index: {}]   ;;  %s932_s2 = inlined_call_operand.hbm [shape: f32[2,1,8,128], index: 2, kind: output, shape index: {0}]   ;;  %s933_s3 = inlined_call_operand.hbm [shape: f32[2,1,8,128], index: 3, kind: output, shape index: {1}]  }
   0x1   :  { %11 = vsyncpa [#allocation3 + $0x1], 0 }
   0x2   :  { %12 = vsyncpa [#allocation6], 0 }
   0x3   :  { %14 = vsyncpa [#allocation6 + $0x1], 0 }
   0x4   :  { %15 = vsyncpa [#allocation4], 0 }
   0x5   :  { %17 = vsyncpa [#allocation4 + $0x1], 0 }
   0x6   :  { %18 = vsyncpa [#allocation9], 0 }
   0x7   :  { %20 = vsyncpa [#allocation9 + $0x1], 0  ;;  %s779_s12 = smov 0   ;;  %s781_s13 = smov 0  }
   0x8   :  { %s783_s14 = smov 0   ;;  %s785_s15 = smov 0  }
   0x9   :  { %s787_s16 = smov 0   ;;  %s789_s17 = smov 0  }
   0xa LB: > { %s486_s18 = sadd.s32 4294967295, %s757_s17   ;;  %s487_s19 = sadd.s32 4294967294, %s757_s17   ;;  %s757_s17 = sphi %s789_s17, %s26_s17   ;;  %s753_s16 = sphi %s787_s16, %s942_s16   ;;  %s749_s15 = sphi %s785_s15, %s941_s15   ;;  %s745_s14 = sphi %s783_s14, %s940_s14   ;;  %s741_s13 = sphi %s781_s13, %s939_s13   ;;  %s737_s12 = sphi %s779_s12, %s938_s12  }
   0xb   : > { %s45_s20 = sadd.s32 1, %s753_s16  ;;  %s60_s21 = sadd.s32 1, %s745_s14 }
   0xc   : > { %p47_p0 = scmp.ge.s32.totalorder %s45_s20, 2  ;;  %p67_p1 = scmp.ne.s32.totalorder %s745_s14, %s741_s13 }
   0xd   : > { %p68_p2 = scmp.eq.s32.totalorder %s757_s17, 0  ;;  %p73_p3 = scmp.ne.s32.totalorder %s741_s13, %s737_s12 }
   0xe   : > { %s944_s20 = smov (%p47_p0, %s45_s20), 0  ;;  %p74_p5 = scmp.eq.s32.totalorder %s486_s18, 0 }
   0xf   : > { %p820_p4 = por %p68_p2, %p67_p1  ;;  %s55_s23 = ssub.s32 %s753_s16, %s944_s20 }
  0x10   : > { %p133_p6 = scmp.eq.s32.totalorder %s486_s18, 1  ;;  %p58_p7 = scmp.eq.s32.totalorder %s55_s23, 0 }
  0x11   : > { %p826_p8 = por %p74_p5, %p73_p3  ;;  %p139_p10 = scmp.eq.s32.totalorder %s487_s19, 1 }
  0x12   : > { %p830_p9 = por %p133_p6, %p67_p1  ;;  %p489_p12 = scmp.ge.s32.totalorder %s757_s17, 2 }
  0x13   : > { %s835_s26 = scalar_select %p58_p7, %s745_s14, %s60_s21  }
  0x14   : > { %p837_p11 = por %p139_p10, %p73_p3  ;;  %p527_p13 = scmp.lt.s32.totalorder %s757_s17, 2 }
  0x15   : > { %s187_s28 = sand.u32 1, %s745_s14   ;;  %s491_s30 = sshll.u32 %s753_s16, 3 }
  0x16   : > { %s490_s29 = sshll.u32 %s187_s28, 3  ;;  %s199_s6 = scalar_lea.hbm %s930_s0, %s491_s30 }
  0x17   : > { %s191_s7 = scalar_lea.vmem [#allocation2], %s490_s29  ;;  %s201_s9 = sshll.u32 %s199_s6, 4  ;;  %s202_s9 = int_to_ptr.hbm [resolvable:$true] %s201_s9 }
  0x18   : > { %s203_s8 = sshll.u32 %s191_s7, 4  ;;  %p514_p0 = pnand %p527_p13, %p820_p4  ;;  %s204_s8 = int_to_ptr.vmem [resolvable:$true] %s203_s8 }
  0x19   : > { %p494_p1 = scmp.ge.s32.totalorder %s757_s17, 1  ;;  %p231_p2 = scmp.lt.s32.totalorder %s757_s17, 3 }
  0x1a   : > { %s188_s10 = scalar_lea.sflag [#allocation3], %s187_s28  ;;  %s222_s19 = scalar_lea.hbm %s931_s1, %s491_s30 }
  0x1b   : > { %516 = dma.hbm_to_vmem [thread:$0]  (!%p514_p0), %s202_s9, 128, %s204_s8, %s188_s10  }
  0x1c   : > { %p232_p3 = pnand %p494_p1, %p231_p2  ;;  %s214_s21 = scalar_lea.vmem [#allocation5], %s490_s29 }
  0x1d   : > { %s226_s23 = sshll.u32 %s214_s21, 4  ;;  %s224_s4 = sshll.u32 %s222_s19, 4  ;;  %s227_s23 = int_to_ptr.vmem [resolvable:$true] %s226_s23  ;;  %s225_s4 = int_to_ptr.hbm [resolvable:$true] %s224_s4 }
  0x1e   : > { %s211_s5 = scalar_lea.sflag [#allocation6], %s187_s28  ;;  %235 = sbr.rel (%p232_p3) target bundleno = 67 (0x43), region = 28 }
  0x1f   : > { %519 = dma.hbm_to_vmem [thread:$0]  (!%p514_p0), %s225_s4, 128, %s227_s23, %s211_s5  }
  0x20   : > { %s856_s22 = sand.u32 (!%p232_p3), 1, %s741_s13  }
  0x21   : > { %s859_s6 = sshll.u32 (!%p232_p3), %s856_s22, 3  ;;  %s238_s7 = scalar_lea.sflag (!%p232_p3), [#allocation3], %s856_s22 }
  0x22   : > { %s241_s8 = scalar_lea.vmem (!%p232_p3), [#allocation2], %s859_s6 }
  0x23   : > { %720 = dma.done.wait (%p826_p8), %s238_s7, 128  }
  0x24   : > { %722 = vsyncadd (%p826_p8), %s238_s7, 4294967168  ;;  %s248_s28 = scalar_lea.sflag [#allocation6], %s856_s22  ;;  %s251_s29 = scalar_lea.vmem [#allocation5], %s859_s6 }
  0x25   : > { %724 = dma.done.wait (%p826_p8), %s248_s28, 128  }
  0x26   : > { %726 = vsyncadd (%p826_p8), %s248_s28, 4294967168  ;;  %s501_s30 = sshll.u32 %s749_s15, 3  ;;  %s284_s18 = scalar_lea.vmem [#allocation8], %s859_s6  ;;  %v297_v0 = vld [vmem:[%s241_s8] sm:$0xff]  ;;  %v298_v1 = vld [vmem:[%s251_s29] sm:$0xff] }
  0x27   : > { %s340_s11 = scalar_lea.hbm %s933_s3, %s501_s30  ;;  %s342_s19 = sshll.u32 %s284_s18, 4  ;;  %v299_v2 = vsub.f32 %v298_v1, %v297_v0  ;;  %307 = vst [vmem:[%s284_s18] sm:$0xff] %v298_v1  ;;  %s343_s19 = int_to_ptr.vmem [resolvable:$true] %s342_s19 }
  0x28   : > { %s325_s4 = scalar_lea.hbm %s932_s2, %s501_s30  ;;  %s344_s5 = sshll.u32 %s340_s11, 4  ;;  %s345_s5 = int_to_ptr.hbm [resolvable:$true] %s344_s5 }
  0x29   : > { %s277_s24 = scalar_lea.vmem [#allocation7], %s859_s6  ;;  %s329_s7 = sshll.u32 %s325_s4, 4  ;;  %v300_v3 = vmul.f32 %v299_v2, %v299_v2  ;;  %s330_s7 = int_to_ptr.hbm [resolvable:$true] %s329_s7 }
  0x2a   : > { %s882_s15 = sshll.u32 %s277_s24, 4  ;;  %s314_s28 = scalar_lea.sflag [#allocation9], %s856_s22  ;;  %s328_s15 = int_to_ptr.vmem [resolvable:$true] %s882_s15 }
  0x2b   : > { %s653_s9 = sshra.s32 %s345_s5, 4  ;;  %s659_s29 = scalar_lea.hbm %s933_s3, 16  ;;  %s654_s9 = int_to_ptr.hbm [resolvable:$true] %s653_s9 }
  0x2c   : > { %s655_s10 = scalar_lea.hbm %s654_s9, 8  ;;  %p660_p7 = scmp.lt.s32.totalorder %s654_s9, %s933_s3 }
  0x2d   : > { %p656_p4 = scmp.ne.s32.totalorder %s654_s9, %s655_s10  ;;  %p661_p8 = scmp.lt.s32.totalorder %s659_s29, %s655_s10 }
  0x2f   : > { %p657_p5 = pnand %p656_p4, %p830_p9  ;;  %p662_p10 = por %p661_p8, %p660_p7 }
  0x31   : > { %p658_p6 = pneg %p657_p5 }
  0x33   : > { %p663_p13 = pnand %p662_p10, %p658_p6 }
  0x35   : > { %666 = shalt.err (!%p663_p13)
}
  0x36   : > { %510 = dma.vmem_to_hbm [thread:$0]  (%p830_p9), %s343_s19, 128, %s345_s5, %s314_s28   ;;  %304 = vst [vmem:[%s277_s24] sm:$0xff] %v300_v3 }
  0x37   : > { %s309_s6 = scalar_lea.sflag [#allocation4], %s856_s22  ;;  %s681_s18 = sshra.s32 %s330_s7, 4  ;;  %s682_s18 = int_to_ptr.hbm [resolvable:$true] %s681_s18 }
  0x38   : > { %s683_s23 = scalar_lea.hbm %s682_s18, 8  ;;  %s687_s10 = scalar_lea.hbm %s932_s2, 16 }
  0x39   : > { %p684_p0 = scmp.ne.s32.totalorder %s682_s18, %s683_s23  ;;  %p688_p3 = scmp.lt.s32.totalorder %s682_s18, %s932_s2 }
  0x3a   : > { %p689_p4 = scmp.lt.s32.totalorder %s687_s10, %s683_s23 }
  0x3b   : > { %p685_p1 = pnand %p684_p0, %p830_p9 }
  0x3c   : > { %p690_p5 = por %p689_p4, %p688_p3 }
  0x3d   : > { %p686_p2 = pneg %p685_p1 }
  0x3f   : > { %p691_p6 = pnand %p690_p5, %p686_p2 }
  0x41   : > { %694 = shalt.err (!%p691_p6)
}
  0x42   : > { %509 = dma.vmem_to_hbm [thread:$0]  (%p830_p9), %s328_s15, 128, %s330_s7, %s309_s6  }
  0x43 PF: > { %s356_s22 = sand.u32 1, %s737_s12   ;;  %p521_p7 = pnand %p489_p12, %p837_p11 }
  0x44   : > { %s357_s19 = scalar_lea.sflag [#allocation4], %s356_s22 }
  0x45   : > { %p522_p8 = pneg %p521_p7 }
  0x47   : > { %728 = dma.done.wait (%p522_p8), %s357_s19, 128  }
  0x48   : > { %730 = vsyncadd (%p522_p8), %s357_s19, 4294967168  ;;  %s367_s5 = scalar_lea.sflag [#allocation9], %s356_s22 }
  0x49   : > { %732 = dma.done.wait (%p522_p8), %s367_s5, 128  }
  0x4a   : > { %734 = vsyncadd (%p522_p8), %s367_s5, 4294967168  ;;  %s26_s17 = sadd.s32 1, %s757_s17   ;;  %s938_s12 = smov %s741_s13 }
  0x4b   : > { %p23_p10 = scmp.ge.s32.totalorder %s26_s17, 4   ;;  %s939_s13 = smov %s745_s14 }
  0x4c   : > { %s940_s14 = smov %s835_s26  ;;  %s941_s15 = smov %s753_s16 }
  0x4d   : > { %s942_s16 = smov %s944_s20  ;;  %25 = sbr.rel (!%p23_p10) target bundleno = 10 (0xa), region = 107 }
  0x52   :  { %373 = vsyncpa [#allocation3], 1 }
  0x53   :  { %375 = vsyncpa [#allocation3 + $0x1], 1 }
  0x54   :  { %376 = vsyncpa [#allocation6], 1 }
  0x55   :  { %378 = vsyncpa [#allocation6 + $0x1], 1 }
  0x56   :  { %379 = vsyncpa [#allocation4], 1 }
  0x57   :  { %381 = vsyncpa [#allocation4 + $0x1], 1 }
  0x58   :  { %382 = vsyncpa [#allocation9], 1 }
  0x59   :  { %384 = vsyncpa [#allocation9 + $0x1], 1 }

</bundles_post_ra>
